<compile_context>
chip_gen: v6e
topology: v6e:2x2x1
jax: 0.10.0
libtpu: 0.0.40
codegen_flags: <defaults>
</compile_context>

<pallas_src>
import functools

import jax
import jax.numpy as jnp
from jax.experimental import pallas as pl
from jax.experimental.pallas import tpu as pltpu


# ---------------------------------------------------------------------------
# Fused kernel: conv1 -> BN1 -> ReLU -> conv2 -> BN2 -> ReLU, all in VMEM.
# Layout: channels in sublanes, flattened (t, n, h, w) positions in lanes.
# ---------------------------------------------------------------------------
def _fused_kernel(xcat_ref, w1_ref, w2_ref, g1_ref, b1_ref, g2_ref, b2_ref,
                  out_ref, *, M, t_shift, eps):
    inv_m = 1.0 / M

    # ---- conv1: one K = 9*Cin bf16 matmul (circular taps packed host-side) ----
    acc1 = jnp.dot(w1_ref[...], xcat_ref[...],
                   preferred_element_type=jnp.float32)            # (hidden, M) f32

    # ---- BatchNorm1 (training mode, biased variance) + ReLU ----
    mean1 = jnp.sum(acc1, axis=1, keepdims=True) * inv_m
    var1 = jnp.maximum(
        jnp.sum(acc1 * acc1, axis=1, keepdims=True) * inv_m - mean1 * mean1, 0.0)
    scale1 = g1_ref[...] * jax.lax.rsqrt(var1 + eps)
    bias1 = b1_ref[...] - mean1 * scale1
    z = jnp.maximum(acc1 * scale1 + bias1, 0.0).astype(jnp.bfloat16)  # (hidden, M)

    # ---- conv2: (3,1,1) temporal conv with zero padding.  Columns are ordered
    # (t, n, h, w), so the t-1 / t+1 taps are lane shifts by exactly one
    # t-plane (t_shift = N*H*W, 128-aligned here) -> aligned block concat. ----
    zpad = jnp.zeros((z.shape[0], t_shift), jnp.bfloat16)
    z_prev = jnp.concatenate([zpad, z[:, :M - t_shift]], axis=1)   # z[t-1], 0 at t=0
    z_next = jnp.concatenate([z[:, t_shift:], zpad], axis=1)       # z[t+1], 0 at t=T-1

    acc2 = jnp.dot(w2_ref[1], z, preferred_element_type=jnp.float32)        # (out, M)
    acc2 = acc2 + jnp.dot(w2_ref[0], z_prev, preferred_element_type=jnp.float32)
    acc2 = acc2 + jnp.dot(w2_ref[2], z_next, preferred_element_type=jnp.float32)

    # ---- BatchNorm2 + ReLU ----
    mean2 = jnp.sum(acc2, axis=1, keepdims=True) * inv_m
    var2 = jnp.maximum(
        jnp.sum(acc2 * acc2, axis=1, keepdims=True) * inv_m - mean2 * mean2, 0.0)
    scale2 = g2_ref[...] * jax.lax.rsqrt(var2 + eps)
    bias2 = b2_ref[...] - mean2 * scale2
    out_ref[...] = jnp.maximum(acc2 * scale2 + bias2, 0.0)


# ---------------------------------------------------------------------------
# Wrapper: host-side (XLA) layout prep + one pallas_call.
# ---------------------------------------------------------------------------
def conv2plus1d_forward(x, w1, w2, gamma1, beta1, gamma2, beta2, eps=1e-5):
    N, Cin, T, H, W = x.shape
    hidden = w1.shape[0]
    out_depth = w2.shape[0]
    M = N * T * H * W
    K1 = 9 * Cin
    t_shift = N * H * W      # lane distance between consecutive t planes

    # Lane-dense im2col of the 9 circular (1,3,3) taps, channels-in-sublanes /
    # spatial-in-lanes, columns ordered (t, n, h, w).  Tiny (<100 KB) XLA op.
    taps = [jnp.roll(x, (1 - kh, 1 - kw), axis=(3, 4))
            for kh in range(3) for kw in range(3)]
    xcat = (jnp.stack(taps, axis=0)              # (9, N, Cin, T, H, W)
            .transpose(0, 2, 3, 1, 4, 5)         # (9, Cin, T, N, H, W)
            .reshape(K1, M)
            .astype(jnp.bfloat16))

    # w1: (hidden, Cin, 1, 3, 3) -> (hidden, 9*Cin), rows match xcat tap order.
    w1cat = (w1[:, :, 0]                         # (hidden, Cin, 3, 3)
             .transpose(0, 2, 3, 1)              # (hidden, kh, kw, Cin)
             .reshape(hidden, K1)
             .astype(jnp.bfloat16))
    # w2: (out, hidden, 3, 1, 1) -> (kt, out, hidden), bf16 for the MXU.
    w2t = (w2[:, :, :, 0, 0]                     # (out, hidden, 3)
           .transpose(2, 0, 1)                   # (3, out, hidden)
           .astype(jnp.bfloat16))

    g1 = gamma1.reshape(hidden, 1).astype(jnp.float32)
    b1 = beta1.reshape(hidden, 1).astype(jnp.float32)
    g2 = gamma2.reshape(out_depth, 1).astype(jnp.float32)
    b2 = beta2.reshape(out_depth, 1).astype(jnp.float32)

    kernel = functools.partial(_fused_kernel, M=M, t_shift=t_shift, eps=eps)
    out_t = pl.pallas_call(
        kernel,
        out_shape=jax.ShapeDtypeStruct((out_depth, M), jnp.float32),
        grid=(1,),
        in_specs=[
            pl.BlockSpec((K1, M), lambda i: (0, 0)),
            pl.BlockSpec((hidden, K1), lambda i: (0, 0)),
            pl.BlockSpec((3, out_depth, hidden), lambda i: (0, 0, 0)),
            pl.BlockSpec((hidden, 1), lambda i: (0, 0)),
            pl.BlockSpec((hidden, 1), lambda i: (0, 0)),
            pl.BlockSpec((out_depth, 1), lambda i: (0, 0)),
            pl.BlockSpec((out_depth, 1), lambda i: (0, 0)),
        ],
        out_specs=pl.BlockSpec((out_depth, M), lambda i: (0, 0)),
        compiler_params=pltpu.CompilerParams(
            dimension_semantics=("arbitrary",),
            vmem_limit_bytes=32 * 1024 * 1024),
    )(xcat, w1cat, w2t, g1, b1, g2, b2)

    # (out, T*N*H*W) -> NCDHW (N, out, T, H, W), matching PyTorch.
    return out_t.reshape(out_depth, T, N, H, W).transpose(2, 0, 1, 3, 4)


# ---------------------------------------------------------------------------
# Independent pure-JAX reference (f32) for a correctness check.
# ---------------------------------------------------------------------------
def _bn_relu_ref(y, gamma, beta, eps):
    mean = jnp.mean(y, axis=(0, 2, 3, 4), keepdims=True)
    var = jnp.var(y, axis=(0, 2, 3, 4), keepdims=True)   # biased (training mode)
    yn = (y - mean) * jax.lax.rsqrt(var + eps)
    yn = yn * gamma.reshape(1, -1, 1, 1, 1) + beta.reshape(1, -1, 1, 1, 1)
    return jnp.maximum(yn, 0.0)


def conv2plus1d_reference(x, w1, w2, gamma1, beta1, gamma2, beta2, eps=1e-5):
    xp = jnp.pad(x, ((0, 0), (0, 0), (0, 0), (1, 1), (1, 1)), mode="wrap")
    y1 = jax.lax.conv_general_dilated(
        xp, w1, window_strides=(1, 1, 1), padding="VALID",
        dimension_numbers=("NCDHW", "OIDHW", "NCDHW"),
        precision=jax.lax.Precision.HIGHEST)
    y1 = _bn_relu_ref(y1, gamma1, beta1, eps)
    y2 = jax.lax.conv_general_dilated(
        y1, w2, window_strides=(1, 1, 1),
        padding=((1, 1), (0, 0), (0, 0)),
        dimension_numbers=("NCDHW", "OIDHW", "NCDHW"),
        precision=jax.lax.Precision.HIGHEST)
    return _bn_relu_ref(y2, gamma2, beta2, eps)


# ---------------------------------------------------------------------------
# Driver
# ---------------------------------------------------------------------------
if __name__ == "__main__":
    # Shapes consistent with the module: batch=2, in_depth=4, T=H=W=8,
    # out_depth=8 -> hidden = 3*3*3*4*8 // (3*3*4 + 3*8) = 14.
    N, Cin, T, H, W = 2, 4, 8, 8, 8
    out_depth = 8
    hidden = 3 * 3 * 3 * Cin * out_depth // (3 * 3 * Cin + 3 * out_depth)

    key = jax.random.PRNGKey(0)
    kx, kw1, kw2, kg1, kb1, kg2, kb2 = jax.random.split(key, 7)

    x = jax.random.normal(kx, (N, Cin, T, H, W), dtype=jnp.float32)
    w1 = 0.1 * jax.random.normal(kw1, (hidden, Cin, 1, 3, 3), dtype=jnp.float32)
    w2 = 0.1 * jax.random.normal(kw2, (out_depth, hidden, 3, 1, 1), dtype=jnp.float32)
    gamma1 = 1.0 + 0.2 * jax.random.normal(kg1, (hidden,), dtype=jnp.float32)
    beta1 = 0.2 * jax.random.normal(kb1, (hidden,), dtype=jnp.float32)
    gamma2 = 1.0 + 0.2 * jax.random.normal(kg2, (out_depth,), dtype=jnp.float32)
    beta2 = 0.2 * jax.random.normal(kb2, (out_depth,), dtype=jnp.float32)

    fwd = jax.jit(conv2plus1d_forward)
    out = jax.block_until_ready(fwd(x, w1, w2, gamma1, beta1, gamma2, beta2))

    assert out.shape == (N, out_depth, T, H, W), out.shape
    assert bool(jnp.all(out >= 0.0))   # ReLU output is non-negative

    ref = jax.block_until_ready(
        jax.jit(conv2plus1d_reference)(x, w1, w2, gamma1, beta1, gamma2, beta2))
    max_err = float(jnp.max(jnp.abs(out - ref)))
    # bf16 MXU operands vs. the f32 reference -> small, bounded deviation.
    assert max_err < 0.25, f"max abs error vs reference: {max_err}"

    print("KERNEL_OK")
</pallas_src>

<mosaic_0001>
module attributes {stable_mosaic.version = 11 : i64} {
  func.func @_fused_kernel(%arg0: i32, %arg1: memref<36x1024xbf16, #tpu.memory_space<vmem>>, %arg2: memref<14x36xbf16, #tpu.memory_space<vmem>>, %arg3: memref<3x8x14xbf16, #tpu.memory_space<vmem>>, %arg4: memref<14x1xf32, #tpu.memory_space<vmem>>, %arg5: memref<14x1xf32, #tpu.memory_space<vmem>>, %arg6: memref<8x1xf32, #tpu.memory_space<vmem>>, %arg7: memref<8x1xf32, #tpu.memory_space<vmem>>, %arg8: memref<8x1024xf32, #tpu.memory_space<vmem>>) attributes {dimension_semantics = [#tpu.dimension_semantics<arbitrary>], iteration_bounds = array<i64: 1>, scalar_prefetch = 0 : i64, scratch_operands = 0 : i64, tpu.core_type = #tpu.core_type<tc>, window_params = [{pipeline_mode = #tpu.pipeline_mode<synchronous>, transform_indices = @transform_0, window_bounds = array<i64: 36, 1024>}, {pipeline_mode = #tpu.pipeline_mode<synchronous>, transform_indices = @transform_1, window_bounds = array<i64: 14, 36>}, {pipeline_mode = #tpu.pipeline_mode<synchronous>, transform_indices = @transform_2, window_bounds = array<i64: 3, 8, 14>}, {pipeline_mode = #tpu.pipeline_mode<synchronous>, transform_indices = @transform_3, window_bounds = array<i64: 14, 1>}, {pipeline_mode = #tpu.pipeline_mode<synchronous>, transform_indices = @transform_4, window_bounds = array<i64: 14, 1>}, {pipeline_mode = #tpu.pipeline_mode<synchronous>, transform_indices = @transform_5, window_bounds = array<i64: 8, 1>}, {pipeline_mode = #tpu.pipeline_mode<synchronous>, transform_indices = @transform_6, window_bounds = array<i64: 8, 1>}, {pipeline_mode = #tpu.pipeline_mode<synchronous>, transform_indices = @transform_7, window_bounds = array<i64: 8, 1024>}]} {
    %c0 = arith.constant 0 : index
    %c0_0 = arith.constant 0 : index
    %0 = vector.load %arg2[%c0, %c0_0] : memref<14x36xbf16, #tpu.memory_space<vmem>>, vector<14x36xbf16>
    %c0_1 = arith.constant 0 : index
    %c0_2 = arith.constant 0 : index
    %1 = vector.load %arg1[%c0_1, %c0_2] : memref<36x1024xbf16, #tpu.memory_space<vmem>>, vector<36x1024xbf16>
    %cst = arith.constant dense<0.000000e+00> : vector<14x1024xf32>
    %2 = tpu.matmul %0, %1, %cst {dimension_numbers = #tpu.dot_dimension_numbers<[1], [0], [0], [1], [0, 0, 1, 1], [], []>} : vector<14x36xbf16>, vector<36x1024xbf16>, vector<14x1024xf32> -> vector<14x1024xf32>
    %cst_3 = arith.constant dense<0.000000e+00> : vector<14xf32>
    %3 = vector.multi_reduction <add>, %2, %cst_3 [1] : vector<14x1024xf32> to vector<14xf32>
    %4 = vector.shape_cast %3 : vector<14xf32> to vector<14x1xf32>
    %cst_4 = arith.constant 9.765625E-4 : f32
    %5 = vector.broadcast %cst_4 : f32 to vector<14x1xf32>
    %6 = arith.mulf %4, %5 : vector<14x1xf32>
    %7 = arith.mulf %2, %2 : vector<14x1024xf32>
    %cst_5 = arith.constant dense<0.000000e+00> : vector<14xf32>
    %8 = vector.multi_reduction <add>, %7, %cst_5 [1] : vector<14x1024xf32> to vector<14xf32>
    %9 = vector.shape_cast %8 : vector<14xf32> to vector<14x1xf32>
    %cst_6 = arith.constant 9.765625E-4 : f32
    %10 = vector.broadcast %cst_6 : f32 to vector<14x1xf32>
    %11 = arith.mulf %9, %10 : vector<14x1xf32>
    %12 = arith.mulf %6, %6 : vector<14x1xf32>
    %13 = arith.subf %11, %12 : vector<14x1xf32>
    %cst_7 = arith.constant 0.000000e+00 : f32
    %14 = vector.broadcast %cst_7 : f32 to vector<14x1xf32>
    %15 = arith.maximumf %13, %14 : vector<14x1xf32>
    %c0_8 = arith.constant 0 : index
    %c0_9 = arith.constant 0 : index
    %16 = vector.load %arg4[%c0_8, %c0_9] : memref<14x1xf32, #tpu.memory_space<vmem>>, vector<14x1xf32>
    %cst_10 = arith.constant 9.99999974E-6 : f32
    %17 = vector.broadcast %cst_10 : f32 to vector<14x1xf32>
    %18 = arith.addf %15, %17 : vector<14x1xf32>
    %19 = math.rsqrt %18 : vector<14x1xf32>
    %20 = arith.mulf %16, %19 : vector<14x1xf32>
    %c0_11 = arith.constant 0 : index
    %c0_12 = arith.constant 0 : index
    %21 = vector.load %arg5[%c0_11, %c0_12] : memref<14x1xf32, #tpu.memory_space<vmem>>, vector<14x1xf32>
    %22 = arith.mulf %6, %20 : vector<14x1xf32>
    %23 = arith.subf %21, %22 : vector<14x1xf32>
    %24 = vector.broadcast %20 : vector<14x1xf32> to vector<14x1024xf32>
    %25 = arith.mulf %2, %24 : vector<14x1024xf32>
    %26 = vector.broadcast %23 : vector<14x1xf32> to vector<14x1024xf32>
    %27 = arith.addf %25, %26 : vector<14x1024xf32>
    %cst_13 = arith.constant 0.000000e+00 : f32
    %28 = vector.broadcast %cst_13 : f32 to vector<14x1024xf32>
    %29 = arith.maximumf %27, %28 : vector<14x1024xf32>
    %30 = arith.truncf %29 : vector<14x1024xf32> to vector<14x1024xbf16>
    %cst_14 = arith.constant 0.000000e+00 : bf16
    %31 = vector.broadcast %cst_14 : bf16 to vector<14x128xbf16>
    %32 = vector.extract_strided_slice %30 {offsets = [0, 0], sizes = [14, 896], strides = [1, 1]} : vector<14x1024xbf16> to vector<14x896xbf16>
    %33 = tpu.concatenate %31, %32 in 1 : vector<14x128xbf16>, vector<14x896xbf16> -> vector<14x1024xbf16>
    %34 = vector.extract_strided_slice %30 {offsets = [0, 128], sizes = [14, 896], strides = [1, 1]} : vector<14x1024xbf16> to vector<14x896xbf16>
    %35 = tpu.concatenate %34, %31 in 1 : vector<14x896xbf16>, vector<14x128xbf16> -> vector<14x1024xbf16>
    %c1 = arith.constant 1 : index
    %c0_15 = arith.constant 0 : index
    %c0_16 = arith.constant 0 : index
    %36 = vector.load %arg3[%c1, %c0_15, %c0_16] : memref<3x8x14xbf16, #tpu.memory_space<vmem>>, vector<1x8x14xbf16>
    %37 = vector.shape_cast %36 : vector<1x8x14xbf16> to vector<8x14xbf16>
    %cst_17 = arith.constant dense<0.000000e+00> : vector<8x1024xf32>
    %38 = tpu.matmul %37, %30, %cst_17 {dimension_numbers = #tpu.dot_dimension_numbers<[1], [0], [0], [1], [0, 0, 1, 1], [], []>} : vector<8x14xbf16>, vector<14x1024xbf16>, vector<8x1024xf32> -> vector<8x1024xf32>
    %c0_18 = arith.constant 0 : index
    %c0_19 = arith.constant 0 : index
    %c0_20 = arith.constant 0 : index
    %39 = vector.load %arg3[%c0_18, %c0_19, %c0_20] : memref<3x8x14xbf16, #tpu.memory_space<vmem>>, vector<1x8x14xbf16>
    %40 = vector.shape_cast %39 : vector<1x8x14xbf16> to vector<8x14xbf16>
    %cst_21 = arith.constant dense<0.000000e+00> : vector<8x1024xf32>
    %41 = tpu.matmul %40, %33, %cst_21 {dimension_numbers = #tpu.dot_dimension_numbers<[1], [0], [0], [1], [0, 0, 1, 1], [], []>} : vector<8x14xbf16>, vector<14x1024xbf16>, vector<8x1024xf32> -> vector<8x1024xf32>
    %42 = arith.addf %38, %41 : vector<8x1024xf32>
    %c2 = arith.constant 2 : index
    %c0_22 = arith.constant 0 : index
    %c0_23 = arith.constant 0 : index
    %43 = vector.load %arg3[%c2, %c0_22, %c0_23] : memref<3x8x14xbf16, #tpu.memory_space<vmem>>, vector<1x8x14xbf16>
    %44 = vector.shape_cast %43 : vector<1x8x14xbf16> to vector<8x14xbf16>
    %cst_24 = arith.constant dense<0.000000e+00> : vector<8x1024xf32>
    %45 = tpu.matmul %44, %35, %cst_24 {dimension_numbers = #tpu.dot_dimension_numbers<[1], [0], [0], [1], [0, 0, 1, 1], [], []>} : vector<8x14xbf16>, vector<14x1024xbf16>, vector<8x1024xf32> -> vector<8x1024xf32>
    %46 = arith.addf %42, %45 : vector<8x1024xf32>
    %cst_25 = arith.constant dense<0.000000e+00> : vector<8xf32>
    %47 = vector.multi_reduction <add>, %46, %cst_25 [1] : vector<8x1024xf32> to vector<8xf32>
    %48 = vector.shape_cast %47 : vector<8xf32> to vector<8x1xf32>
    %cst_26 = arith.constant 9.765625E-4 : f32
    %49 = vector.broadcast %cst_26 : f32 to vector<8x1xf32>
    %50 = arith.mulf %48, %49 : vector<8x1xf32>
    %51 = arith.mulf %46, %46 : vector<8x1024xf32>
    %cst_27 = arith.constant dense<0.000000e+00> : vector<8xf32>
    %52 = vector.multi_reduction <add>, %51, %cst_27 [1] : vector<8x1024xf32> to vector<8xf32>
    %53 = vector.shape_cast %52 : vector<8xf32> to vector<8x1xf32>
    %cst_28 = arith.constant 9.765625E-4 : f32
    %54 = vector.broadcast %cst_28 : f32 to vector<8x1xf32>
    %55 = arith.mulf %53, %54 : vector<8x1xf32>
    %56 = arith.mulf %50, %50 : vector<8x1xf32>
    %57 = arith.subf %55, %56 : vector<8x1xf32>
    %cst_29 = arith.constant 0.000000e+00 : f32
    %58 = vector.broadcast %cst_29 : f32 to vector<8x1xf32>
    %59 = arith.maximumf %57, %58 : vector<8x1xf32>
    %c0_30 = arith.constant 0 : index
    %c0_31 = arith.constant 0 : index
    %60 = vector.load %arg6[%c0_30, %c0_31] : memref<8x1xf32, #tpu.memory_space<vmem>>, vector<8x1xf32>
    %cst_32 = arith.constant 9.99999974E-6 : f32
    %61 = vector.broadcast %cst_32 : f32 to vector<8x1xf32>
    %62 = arith.addf %59, %61 : vector<8x1xf32>
    %63 = math.rsqrt %62 : vector<8x1xf32>
    %64 = arith.mulf %60, %63 : vector<8x1xf32>
    %c0_33 = arith.constant 0 : index
    %c0_34 = arith.constant 0 : index
    %65 = vector.load %arg7[%c0_33, %c0_34] : memref<8x1xf32, #tpu.memory_space<vmem>>, vector<8x1xf32>
    %66 = arith.mulf %50, %64 : vector<8x1xf32>
    %67 = arith.subf %65, %66 : vector<8x1xf32>
    %68 = vector.broadcast %64 : vector<8x1xf32> to vector<8x1024xf32>
    %69 = arith.mulf %46, %68 : vector<8x1024xf32>
    %70 = vector.broadcast %67 : vector<8x1xf32> to vector<8x1024xf32>
    %71 = arith.addf %69, %70 : vector<8x1024xf32>
    %cst_35 = arith.constant 0.000000e+00 : f32
    %72 = vector.broadcast %cst_35 : f32 to vector<8x1024xf32>
    %73 = arith.maximumf %71, %72 : vector<8x1024xf32>
    %c0_36 = arith.constant 0 : index
    %c0_37 = arith.constant 0 : index
    %74 = vector.load %arg8[%c0_36, %c0_37] : memref<8x1024xf32, #tpu.memory_space<vmem>>, vector<8x1024xf32>
    tpu.vector_store %arg8[%c0_36, %c0_37], %73 {strides = array<i32>} : memref<8x1024xf32, #tpu.memory_space<vmem>>, vector<8x1024xf32>,
    return
  }
  func.func @transform_0(%arg0: i32) -> (i32, i32) {
    %c0_i32 = arith.constant 0 : i32
    %c0_i32_0 = arith.constant 0 : i32
    %c0_i32_1 = arith.constant 0 : i32
    return %c0_i32, %c0_i32_0 : i32, i32
  }
  func.func @transform_1(%arg0: i32) -> (i32, i32) {
    %c0_i32 = arith.constant 0 : i32
    %c0_i32_0 = arith.constant 0 : i32
    %c0_i32_1 = arith.constant 0 : i32
    return %c0_i32, %c0_i32_0 : i32, i32
  }
  func.func @transform_2(%arg0: i32) -> (i32, i32, i32) {
    %c0_i32 = arith.constant 0 : i32
    %c0_i32_0 = arith.constant 0 : i32
    %c0_i32_1 = arith.constant 0 : i32
    %c0_i32_2 = arith.constant 0 : i32
    return %c0_i32, %c0_i32_0, %c0_i32_1 : i32, i32, i32
  }
  func.func @transform_3(%arg0: i32) -> (i32, i32) {
    %c0_i32 = arith.constant 0 : i32
    %c0_i32_0 = arith.constant 0 : i32
    %c0_i32_1 = arith.constant 0 : i32
    return %c0_i32, %c0_i32_0 : i32, i32
  }
  func.func @transform_4(%arg0: i32) -> (i32, i32) {
    %c0_i32 = arith.constant 0 : i32
    %c0_i32_0 = arith.constant 0 : i32
    %c0_i32_1 = arith.constant 0 : i32
    return %c0_i32, %c0_i32_0 : i32, i32
  }
  func.func @transform_5(%arg0: i32) -> (i32, i32) {
    %c0_i32 = arith.constant 0 : i32
    %c0_i32_0 = arith.constant 0 : i32
    %c0_i32_1 = arith.constant 0 : i32
    return %c0_i32, %c0_i32_0 : i32, i32
  }
  func.func @transform_6(%arg0: i32) -> (i32, i32) {
    %c0_i32 = arith.constant 0 : i32
    %c0_i32_0 = arith.constant 0 : i32
    %c0_i32_1 = arith.constant 0 : i32
    return %c0_i32, %c0_i32_0 : i32, i32
  }
  func.func @transform_7(%arg0: i32) -> (i32, i32) {
    %c0_i32 = arith.constant 0 : i32
    %c0_i32_0 = arith.constant 0 : i32
    %c0_i32_1 = arith.constant 0 : i32
    return %c0_i32, %c0_i32_0 : i32, i32
  }
}

</mosaic_0001>

<bundles_post_ra>
// kernel: conv2plus1d_forward.1
= control target key start
LH: loop header
LB: loop body
LE: loop exit
PB: predicated region body
PF: predicated region fallthrough
CT: control target
= control target key end

     0   :  { %vm158_vm0 = vcmask 1041408   ;;  %v1237_v3 = vmov 0   ;;  %vm154_vm1 = vcmask 293888   ;;  %vm364_vm2 = vcmask 1045504   ;;  %s1605_s0 = inlined_call_operand.vmem [shape: bf16[36,1024], index: 0, kind: input, shape index: {}]   ;;  %s1606_s1 = inlined_call_operand.vmem [shape: bf16[14,36], index: 1, kind: input, shape index: {}]   ;;  %s1607_s3 = inlined_call_operand.vmem [shape: f32[14,1], index: 3, kind: input, shape index: {}]   ;;  %s1608_s4 = inlined_call_operand.vmem [shape: f32[14,1], index: 4, kind: input, shape index: {}]   ;;  %s1609_s2 = inlined_call_operand.vmem [shape: bf16[3,8,14], index: 2, kind: input, shape index: {}]   ;;  %s1610_s5 = inlined_call_operand.vmem [shape: f32[8,1], index: 5, kind: input, shape index: {}]   ;;  %s1611_s6 = inlined_call_operand.vmem [shape: f32[8,1], index: 6, kind: input, shape index: {}]   ;;  %s1612_s7 = inlined_call_operand.vmem [shape: f32[8,1024], index: 7, kind: output, shape index: {}]  }
   0x1   :  { %v45_v0 = vld [vmem:[%s1605_s0 + $0x80] sm:$0x33]  ;;  %v46_v1 = vld [vmem:[%s1605_s0 + $0x88] sm:$0x33]  ;;  %215 = vmatprep.mubr.bf16.mxu0 %v1237_v3  ;;  %258 = vmatprep.mubr.bf16.mxu1 %v1237_v3  ;;  %v47_v23 = vld [vmem:[%s1605_s0 + $0x90] sm:$0x33] }
   0x2   :  { %v37_v2 = vld [vmem:[%s1605_s0 + $0x40] sm:$0xff]  ;;  %v1169_v4 = vcombine.high %v45_v0, %v45_v0  ;;  %v1171_v5 = vcombine.high %v46_v1, %v46_v1  ;;  %v1168_v6 = vcombine.low %v45_v0, %v45_v0  ;;  %v1170_v7 = vcombine.low %v46_v1, %v46_v1  ;;  %v38_v9 = vld [vmem:[%s1605_s0 + $0x48] sm:$0xff]  ;;  %1220 = vset.pattern.permute.xlu0 %v1237_v3  ;;  %v48_v24 = vld [vmem:[%s1605_s0 + $0x98] sm:$0x33] }
   0x3   :  { %v41_v8 = vld [vmem:[%s1605_s0 + $0x60] sm:$0xff]  ;;  %v42_v10 = vld [vmem:[%s1605_s0 + $0x68] sm:$0xff]  ;;  %1221 = vset.pattern.permute.xlu1 %v1237_v3  ;;  %v1173_v27 = vcombine.high %v47_v23, %v47_v23  ;;  %v1175_v28 = vcombine.high %v48_v24, %v48_v24  ;;  %v1172_v29 = vcombine.low %v47_v23, %v47_v23  ;;  %v1174_v30 = vcombine.low %v48_v24, %v48_v24  ;;  %v39_v31 = vld [vmem:[%s1605_s0 + $0x50] sm:$0xff] }
   0x4   :  { %v1161_v11 = vcombine.high %v37_v2, %v41_v8  ;;  %v1163_v12 = vcombine.high %v38_v9, %v42_v10  ;;  %v29_v13 = vld [vmem:[%s1605_s0] sm:$0xff]  ;;  %v30_v15 = vld [vmem:[%s1605_s0 + $0x8] sm:$0xff]  ;;  %1176 = vmatprep.subr.msk.bf16.mxu0 %vm158_vm0, %v1169_v4  ;;  %1178 = vmatprep.subr.msk.bf16.mxu1 %vm158_vm0, %v1171_v5  ;;  %v160_v16 = vsel %vm158_vm0, %v1168_v6, 0  ;;  %v166_v17 = vsel %vm158_vm0, %v1170_v7, 0  ;;  %v43_v32 = vld [vmem:[%s1605_s0 + $0x70] sm:$0xff] }
   0x5   :  { %v33_v14 = vld [vmem:[%s1605_s0 + $0x20] sm:$0xff]  ;;  %v34_v18 = vld [vmem:[%s1605_s0 + $0x28] sm:$0xff]  ;;  %194 = vmatpush1.bf16.msra.mxu0 %v160_v16  ;;  %237 = vmatpush1.bf16.msra.mxu1 %v166_v17  ;;  %v1160_v19 = vcombine.low %v37_v2, %v41_v8  ;;  %v1162_v20 = vcombine.low %v38_v9, %v42_v10  ;;  %v40_v33 = vld [vmem:[%s1605_s0 + $0x58] sm:$0xff]  ;;  %v172_v36 = vsel %vm158_vm0, %v1172_v29, 0  ;;  %v178_v37 = vsel %vm158_vm0, %v1174_v30, 0 }
   0x6   :  { %195 = vmatprep.subr.bf16.mxu0 %v1161_v11  ;;  %238 = vmatprep.subr.bf16.mxu1 %v1163_v12  ;;  %v1153_v21 = vcombine.high %v29_v13, %v33_v14  ;;  %v1155_v22 = vcombine.high %v30_v15, %v34_v18  ;;  %v1152_v25 = vcombine.low %v29_v13, %v33_v14  ;;  %v44_v34 = vld [vmem:[%s1605_s0 + $0x78] sm:$0xff]  ;;  %v1226_v35 = vld [vmem:[%s1606_s1] sm:$0x7f]   ;;  %v31_v40 = vld [vmem:[%s1605_s0 + $0x10] sm:$0xff]  ;;  %vm531_vm3 = vcmask 1046528  }
   0x7   :  { %v1154_v26 = vcombine.low %v30_v15, %v34_v18  ;;  %v1165_v38 = vcombine.high %v39_v31, %v43_v32  ;;  %v1167_v39 = vcombine.high %v40_v33, %v44_v34  ;;  %v35_v41 = vld [vmem:[%s1605_s0 + $0x30] sm:$0xff]  ;;  %v32_v42 = vld [vmem:[%s1605_s0 + $0x18] sm:$0xff]  ;;  %v1164_v44 = vcombine.low %v39_v31, %v43_v32 }
   0x8   :  { %v36_v43 = vld [vmem:[%s1605_s0 + $0x38] sm:$0xff]  ;;  %v1166_v45 = vcombine.low %v40_v33, %v44_v34  ;;  %v1157_v46 = vcombine.high %v31_v40, %v35_v41  ;;  %v1156_v48 = vcombine.low %v31_v40, %v35_v41  ;;  %vm527_vm4 = vcmask 113664  }
   0x9   :  { %196 = vmatpush1.bf16.msra.mxu0 %v1160_v19  ;;  %239 = vmatpush1.bf16.msra.mxu1 %v1162_v20  ;;  %v1159_v47 = vcombine.high %v32_v42, %v36_v43  ;;  %v1158_v49 = vcombine.low %v32_v42, %v36_v43  ;;  %vm1239_vm5 = vmmov 0  }
   0xa   :  { %197 = vmatprep.subr.bf16.mxu0 %v1153_v21  ;;  %240 = vmatprep.subr.bf16.mxu1 %v1155_v22 }
   0xd   :  { %198 = vmatpush1.bf16.msra.mxu0 %v1152_v25  ;;  %241 = vmatpush1.bf16.msra.mxu1 %v1154_v26 }
   0xe   :  { %1180 = vmatprep.subr.msk.bf16.mxu0 %vm158_vm0, %v1173_v27  ;;  %1182 = vmatprep.subr.msk.bf16.mxu1 %vm158_vm0, %v1175_v28 }
  0x10   :  { %1177 = vmatmul.mubr.msk.bf16.vlgmr.msra.gmra.mxu0 %vm154_vm1, %v1226_v35  ;;  %1179 = vmatmul.mubr.msk.bf16.vlgmr.msra.gmra.mxu1 %vm154_vm1, %v1226_v35 }
  0x11   :  { %280 = vmatpush1.bf16.msra.mxu0 %v172_v36  ;;  %323 = vmatpush1.bf16.msra.mxu1 %v178_v37 }
  0x12   :  { %281 = vmatprep.subr.bf16.mxu0 %v1165_v38  ;;  %324 = vmatprep.subr.bf16.mxu1 %v1167_v39 }
  0x13   :  { %301 = vmatprep.mubr.bf16.mxu0 %v1237_v3  ;;  %344 = vmatprep.mubr.bf16.mxu1 %v1237_v3 }
  0x15   :  { %282 = vmatpush1.bf16.msra.mxu0 %v1164_v44  ;;  %325 = vmatpush1.bf16.msra.mxu1 %v1166_v45 }
  0x16   :  { %283 = vmatprep.subr.bf16.mxu0 %v1157_v46  ;;  %326 = vmatprep.subr.bf16.mxu1 %v1159_v47 }
  0x19   :  { %284 = vmatpush1.bf16.msra.mxu0 %v1156_v48  ;;  %327 = vmatpush1.bf16.msra.mxu1 %v1158_v49 }
  0x1c   :  { %1181 = vmatmul.mubr.msk.bf16.vlgmr.msra.gmra.mxu0 %vm154_vm1, %v1226_v35  ;;  %1183 = vmatmul.mubr.msk.bf16.vlgmr.msra.gmra.mxu1 %vm154_vm1, %v1226_v35 }
  0x1d   :  { %588 = vmatprep.mubr.bf16.mxu0 %v1237_v3  ;;  %629 = vmatprep.mubr.bf16.mxu1 %v1237_v3 }
  0xd0   :  { %v1363_v50 = vpop.f32.mrf.mxu0  ;;  %v1365_v51 = vpop.f32.mrf.mxu1 }
  0xd1   :  { %v384_v52 = vmul.f32 %v1363_v50, %v1363_v50  ;;  %v386_v58 = vmul.f32 %v1365_v51, %v1365_v51 }
  0xd2   :  { %v1369_v53 = vpop.f32.mrf.mxu0  ;;  %v1371_v54 = vpop.f32.mrf.mxu1 }
  0xd3   :  { %v355_v55 = vadd.f32 %v1369_v53, %v1363_v50  ;;  %v385_v56 = vmul.f32 %v1369_v53, %v1369_v53  ;;  %v387_v6 = vmul.f32 %v1371_v54, %v1371_v54 }
  0xd4   :  { %v1377_v57 = vpop.f32.mrf.mxu0  ;;  %v1381_v60 = vpop.f32.mrf.mxu1 }
  0xd5   :  { %v400_v59 = vadd.f32 %v385_v56, %v384_v52  ;;  %v392_v61 = vmul.f32 %v1377_v57, %v1377_v57  ;;  %v356_v63 = vadd.f32 %v355_v55, %v1365_v51  ;;  %v365_v0 = vsel %vm364_vm2, %v1377_v57, 0.0 }
  0xd6   :  { %v1385_v62 = vpop.f32.mrf.mxu0  ;;  %v394_v2 = vmul.f32 %v1381_v60, %v1381_v60  ;;  %v1398_v8 = vpop.f32.mrf.mxu1  ;;  %v368_v12 = vsel %vm364_vm2, %v1381_v60, 0.0 }
  0xd7   :  { %v366_v1 = vsel %vm364_vm2, %v1385_v62, 0.0  ;;  %v393_v5 = vmul.f32 %v1385_v62, %v1385_v62  ;;  %v401_v7 = vadd.f32 %v400_v59, %v386_v58  ;;  %v409_v9 = vsel %vm364_vm2, %v392_v61, 0.0 }
  0xd8   :  { %v367_v4 = vadd.f32 %v366_v1, %v365_v0  ;;  %v357_v11 = vadd.f32 %v356_v63, %v1371_v54  ;;  %v412_v14 = vsel %vm364_vm2, %v394_v2, 0.0  ;;  %v395_v16 = vmul.f32 %v1398_v8, %v1398_v8 }
  0xd9   :  { %v410_v10 = vsel %vm364_vm2, %v393_v5, 0.0  ;;  %v402_v19 = vadd.f32 %v401_v7, %v387_v6  ;;  %v370_v25 = vsel %vm364_vm2, %v1398_v8, 0.0 }
  0xda   :  { %v411_v13 = vadd.f32 %v410_v10, %v409_v9  ;;  %v369_v15 = vadd.f32 %v368_v12, %v367_v4  ;;  %v414_v30 = vsel %vm364_vm2, %v395_v16, 0.0 }
  0xdc   :  { %v1408_v17 = vpop.f32.mrf.mxu0  ;;  %v1410_v18 = vpop.f32.mrf.mxu1  ;;  %v413_v20 = vadd.f32 %v412_v14, %v411_v13  ;;  %v371_v29 = vadd.f32 %v370_v25, %v369_v15 }
  0xdd   :  { %v358_v21 = vadd.f32 %v357_v11, %v1408_v17  ;;  %v388_v22 = vmul.f32 %v1408_v17, %v1408_v17  ;;  %v390_v31 = vmul.f32 %v1410_v18, %v1410_v18 }
  0xde   :  { %v1415_v23 = vpop.f32.mrf.mxu0  ;;  %v1417_v24 = vpop.f32.mrf.mxu1  ;;  %v415_v34 = vadd.f32 %v414_v30, %v413_v20 }
  0xdf   :  { %v403_v26 = vadd.f32 %v402_v19, %v388_v22  ;;  %v359_v27 = vadd.f32 %v358_v21, %v1415_v23  ;;  %v389_v28 = vmul.f32 %v1415_v23, %v1415_v23  ;;  %v391_v41 = vmul.f32 %v1417_v24, %v1417_v24 }
  0xe0   :  { %v1427_v32 = vpop.f32.mrf.mxu0  ;;  %v1429_v33 = vpop.f32.mrf.mxu1 }
  0xe1   :  { %v372_v35 = vsel %vm364_vm2, %v1427_v32, 0.0  ;;  %v396_v36 = vmul.f32 %v1427_v32, %v1427_v32  ;;  %v360_v40 = vadd.f32 %v359_v27, %v1410_v18  ;;  %v404_v42 = vadd.f32 %v403_v26, %v389_v28  ;;  %v434_v28 = vld [vmem:[%s1607_s3] sm:$0xff] }
  0xe2   :  { %v373_v37 = vadd.f32 %v372_v35, %v371_v29  ;;  %v1435_v38 = vpop.f32.mrf.mxu0  ;;  %v1437_v39 = vpop.f32.mrf.mxu1  ;;  %v398_v44 = vmul.f32 %v1429_v33, %v1429_v33  ;;  %v376_v55 = vsel %vm364_vm2, %v1429_v33, 0.0 }
  0xe3   :  { %v416_v43 = vsel %vm364_vm2, %v396_v36, 0.0  ;;  %v374_v45 = vsel %vm364_vm2, %v1435_v38, 0.0  ;;  %v397_v46 = vmul.f32 %v1435_v38, %v1435_v38  ;;  %v361_v49 = vadd.f32 %v360_v40, %v1417_v24 }
  0xe4   :  { %v417_v47 = vadd.f32 %v416_v43, %v415_v34  ;;  %v375_v48 = vadd.f32 %v374_v45, %v373_v37  ;;  %v405_v52 = vadd.f32 %v404_v42, %v390_v31  ;;  %v399_v58 = vmul.f32 %v1437_v39, %v1437_v39  ;;  %v442_v31 = vld [vmem:[%s1608_s4] sm:$0xff]  ;;  %v435_v34 = vld [vmem:[%s1607_s3 + $0x8] sm:$0x3f] }
  0xe5   :  { %v418_v56 = vsel %vm364_vm2, %v397_v46, 0.0  ;;  %362 = vadd.xlane.f32.xlu0 %v361_v49  ;;  %v378_v0 = vsel %vm364_vm2, %v1437_v39, 0.0  ;;  %v420_v1 = vsel %vm364_vm2, %v398_v44, 0.0  ;;  %v443_v42 = vld [vmem:[%s1608_s4 + $0x8] sm:$0x3f] }
  0xe6   :  { %v406_v59 = vadd.f32 %v405_v52, %v391_v41  ;;  %v377_v61 = vadd.f32 %v376_v55, %v375_v48  ;;  %v419_v63 = vadd.f32 %v418_v56, %v417_v47  ;;  %v422_v5 = vsel %vm364_vm2, %v399_v58, 0.0 }
  0xe8   :  { %407 = vadd.xlane.f32.xlu1 %v406_v59  ;;  %v379_v2 = vadd.f32 %v378_v0, %v377_v61  ;;  %v421_v4 = vadd.f32 %v420_v1, %v419_v63 }
  0xea   :  { %380 = vadd.xlane.f32.xlu0 %v379_v2  ;;  %v423_v6 = vadd.f32 %v422_v5, %v421_v4 }
  0xec   :  { %424 = vadd.xlane.f32.xlu1 %v423_v6 }
 0x16e   :  { %v363_v7 = vpop.xlane.xlu0 %362 }
 0x16f   :  { %v382_v9 = vmul.f32 0.0009765625, %v363_v7 }
 0x171   :  { %v408_v10 = vpop.xlane.xlu1 %407  ;;  %v428_v11 = vmul.f32 %v382_v9, %v382_v9 }
 0x172   :  { %v426_v12 = vmul.f32 0.0009765625, %v408_v10 }
 0x173   :  { %v381_v13 = vpop.xlane.xlu0 %380 }
 0x174   :  { %v430_v14 = vsub.f32 %v426_v12, %v428_v11  ;;  %v383_v15 = vmul.f32 0.0009765625, %v381_v13 }
 0x175   :  { %v425_v16 = vpop.xlane.xlu1 %424 }
 0x176   :  { %v432_v19 = vmax.f32 %v430_v14, 0.0  ;;  %v429_v20 = vmul.f32 %v383_v15, %v383_v15  ;;  %v427_v21 = vmul.f32 0.0009765625, %v425_v16 }
 0x178   :  { %v436_v22 = vadd.f32 1e-05, %v432_v19  ;;  %v431_v25 = vsub.f32 %v427_v21, %v429_v20 }
 0x17a   :  { %1231 = vrsqrt.f32 %v436_v22  ;;  %v433_v26 = vmax.f32 %v431_v25, 0.0 }
 0x17c   :  { %v437_v27 = vadd.f32 1e-05, %v433_v26 }
 0x17e   :  { %1233 = vrsqrt.f32 %v437_v27 }
 0x187   :  { %v1232_v29 = vpop.eup %1231 }
 0x188   :  { %v440_v30 = vmul.f32 %v1232_v29, %v434_v28 }
 0x18a   :  { %450 = vperm.xlu0 %1220, %v440_v30   ;;  %v444_v35 = vmul.f32 %v440_v30, %v382_v9 }
 0x18b   :  { %v1234_v36 = vpop.eup %1233 }
 0x18c   :  { %v446_v37 = vsub.f32 %v442_v31, %v444_v35  ;;  %v441_v40 = vmul.f32 %v1234_v36, %v435_v34  ;;  %v526_v35 = vld [vmem:[%s1609_s2] sm:$0xf] }
 0x18e   :  { %476 = vperm.xlu1 %1221, %v446_v37   ;;  %v445_v41 = vmul.f32 %v441_v40, %v383_v15 }
 0x190   :  { %v447_v43 = vsub.f32 %v443_v42, %v445_v41 }
 0x192   :  { %455 = vperm.xlu1 %1221, %v441_v40  }
 0x196   :  { %481 = vperm.xlu1 %1221, %v447_v43  }
 0x205   :  { %v1471_v44 = vpop.permute.xlu0 %450 }
 0x206   :  { %v458_v46 = vmul.f32 %v1471_v44, %v1363_v50  ;;  %v460_v47 = vmul.f32 %v1471_v44, %v1365_v51  ;;  %v459_v48 = vmul.f32 %v1471_v44, %v1369_v53  ;;  %v462_v56 = vmul.f32 %v1471_v44, %v1408_v17 }
 0x207   :  { %v464_v58 = vmul.f32 %v1471_v44, %v1410_v18  ;;  %v461_v50 = vmul.f32 %v1471_v44, %v1371_v54  ;;  %v463_v53 = vmul.f32 %v1471_v44, %v1415_v23  ;;  %v465_v41 = vmul.f32 %v1471_v44, %v1417_v24 }
 0x209   :  { %v1473_v45 = vpop.permute.xlu1 %476 }
 0x20a   :  { %v484_v49 = vadd.f32 %v1473_v45, %v458_v46  ;;  %v486_v52 = vadd.f32 %v1473_v45, %v460_v47  ;;  %v485_v55 = vadd.f32 %v1473_v45, %v459_v48  ;;  %v488_v51 = vadd.f32 %v1473_v45, %v462_v56 }
 0x20b   :  { %v490_v61 = vadd.f32 %v1473_v45, %v464_v58  ;;  %v487_v63 = vadd.f32 %v1473_v45, %v461_v50  ;;  %v489_v2 = vadd.f32 %v1473_v45, %v463_v53 }
 0x20c   :  { %v500_v0 = vmax.f32 %v484_v49, 0.0  ;;  %v502_v1 = vmax.f32 %v486_v52, 0.0  ;;  %v501_v17 = vmax.f32 %v485_v55, 0.0  ;;  %v504_v23 = vmax.f32 %v488_v51, 0.0  ;;  %v1201_v55 = vld [vmem:[%s1609_s2 + $0x8] sm:$0xf] }
 0x20d   :  { %v456_v59 = vpop.permute.xlu1 %455  ;;  %v503_v22 = vmax.f32 %v487_v63, 0.0  ;;  %v1238_v52 = vmov 0.0  }
 0x20e   :  { %v466_v18 = vmul.f32 %v456_v59, %v1377_v57  ;;  %v468_v54 = vmul.f32 %v456_v59, %v1381_v60  ;;  %v467_v4 = vmul.f32 %v456_v59, %v1385_v62  ;;  %v470_v5 = vmul.f32 %v456_v59, %v1427_v32 }
 0x20f   :  { %v472_v7 = vmul.f32 %v456_v59, %v1429_v33  ;;  %v469_v9 = vmul.f32 %v456_v59, %v1398_v8  ;;  %v471_v10 = vmul.f32 %v456_v59, %v1435_v38  ;;  %v506_v57 = vmax.f32 %v490_v61, 0.0 }
 0x210   :  { %v505_v38 = vmax.f32 %v489_v2, 0.0  ;;  %v473_v36 = vmul.f32 %v456_v59, %v1437_v39  ;;  %v491_v39 = vadd.f32 %v1473_v45, %v465_v41  ;;  %v1184_v45 = vld [vmem:[%s1609_s2 + $0x4] sm:$0xf] }
 0x211   :  { %v482_v6 = vpop.permute.xlu1 %481 }
 0x212   :  { %v492_v11 = vadd.f32 %v482_v6, %v466_v18  ;;  %v494_v12 = vadd.f32 %v482_v6, %v468_v54  ;;  %v493_v13 = vadd.f32 %v482_v6, %v467_v4  ;;  %v496_v14 = vadd.f32 %v482_v6, %v470_v5 }
 0x213   :  { %v498_v15 = vadd.f32 %v482_v6, %v472_v7  ;;  %v495_v16 = vadd.f32 %v482_v6, %v469_v9  ;;  %v497_v60 = vadd.f32 %v482_v6, %v471_v10  ;;  %v499_v42 = vadd.f32 %v482_v6, %v473_v36 }
 0x214   :  { %v508_v19 = vmax.f32 %v492_v11, 0.0  ;;  %v510_v62 = vmax.f32 %v494_v12, 0.0  ;;  %v509_v20 = vmax.f32 %v493_v13, 0.0  ;;  %v512_v32 = vmax.f32 %v496_v14, 0.0 }
 0x215   :  { %v514_v21 = vmax.f32 %v498_v15, 0.0  ;;  %v511_v25 = vmax.f32 %v495_v16, 0.0  ;;  %v513_v33 = vmax.f32 %v497_v60, 0.0  ;;  %v515_v43 = vmax.f32 %v499_v42, 0.0 }
 0x216   :  { %v516_v26 = vpack.c.bf16 %v508_v19, %v500_v0  ;;  %v518_v8 = vpack.c.bf16 %v510_v62, %v502_v1  ;;  %v517_v27 = vpack.c.bf16 %v509_v20, %v501_v17  ;;  %v520_v28 = vpack.c.bf16 %v512_v32, %v504_v23 }
 0x217   :  { %v522_v30 = vpack.c.bf16 %v514_v21, %v506_v57  ;;  %v519_v31 = vpack.c.bf16 %v511_v25, %v503_v22  ;;  %v521_v34 = vpack.c.bf16 %v513_v33, %v505_v38  ;;  %v507_v46 = vmax.f32 %v491_v39, 0.0 }
 0x218   :  { %1185 = vmatprep.subr.msk.bf16.mxu0 %vm531_vm3, %v516_v26  ;;  %1187 = vmatprep.subr.msk.bf16.mxu1 %vm531_vm3, %v518_v8  ;;  %v539_v29 = vsel %vm531_vm3, %v517_v27, 0  ;;  %v536_v24 = vsel %vm531_vm3, %v516_v26, 0  ;;  %v542_v44 = vsel %vm531_vm3, %v518_v8, 0  ;;  %v548_v48 = vsel %vm531_vm3, %v520_v28, 0 }
 0x219   :  { %571 = vmatpush1.bf16.msra.mxu0 %v1237_v3  ;;  %612 = vmatpush1.bf16.msra.mxu1 %v539_v29  ;;  %v545_v37 = vsel %vm531_vm3, %v519_v31, 0  ;;  %v551_v40 = vsel %vm531_vm3, %v521_v34, 0  ;;  %v523_v47 = vpack.c.bf16 %v515_v43, %v507_v46  ;;  %v554_v49 = vsel %vm531_vm3, %v522_v30, 0 }
 0x21a   :  { %1189 = vmatprep.subr.msk.bf16.mxu0 %vm531_vm3, %v520_v28  ;;  %1191 = vmatprep.subr.msk.bf16.mxu1 %vm531_vm3, %v522_v30 }
 0x21b   :  { %v724_v56 = vsel %vm531_vm3, %v523_v47, 0 }
 0x21c   :  { %1186 = vmatmul.mubr.msk.bf16.vlgmr.msra.gmra.mxu0 %vm527_vm4, %v526_v35  ;;  %1188 = vmatmul.mubr.msk.bf16.vlgmr.msra.gmra.mxu1 %vm527_vm4, %v526_v35 }
 0x21d   :  { %653 = vmatpush1.bf16.msra.mxu0 %v545_v37  ;;  %694 = vmatpush1.bf16.msra.mxu1 %v551_v40 }
 0x21e   :  { %1193 = vmatprep.subr.msk.bf16.mxu0 %vm531_vm3, %v517_v27  ;;  %1195 = vmatprep.subr.msk.bf16.mxu1 %vm531_vm3, %v519_v31 }
 0x21f   :  { %670 = vmatprep.mubr.bf16.mxu0 %v1237_v3  ;;  %711 = vmatprep.mubr.bf16.mxu1 %v1237_v3 }
 0x224   :  { %1190 = vmatmul.mubr.msk.bf16.vlgmr.msra.gmra.mxu0 %vm527_vm4, %v526_v35  ;;  %1192 = vmatmul.mubr.msk.bf16.vlgmr.msra.gmra.mxu1 %vm527_vm4, %v526_v35 }
 0x225   :  { %741 = vmatpush1.bf16.msra.mxu0 %v536_v24  ;;  %782 = vmatpush1.bf16.msra.mxu1 %v542_v44 }
 0x226   :  { %1197 = vmatprep.subr.msk.bf16.mxu0 %vm531_vm3, %v521_v34  ;;  %1199 = vmatprep.subr.msk.bf16.mxu1 %vm531_vm3, %v523_v47 }
 0x227   :  { %758 = vmatprep.mubr.bf16.mxu0 %v1237_v3  ;;  %799 = vmatprep.mubr.bf16.mxu1 %v1237_v3 }
 0x22c   :  { %1194 = vmatmul.mubr.msk.bf16.vlgmr.msra.gmra.mxu0 %vm527_vm4, %v1184_v45  ;;  %1196 = vmatmul.mubr.msk.bf16.vlgmr.msra.gmra.mxu1 %vm527_vm4, %v1184_v45 }
 0x22d   :  { %823 = vmatpush1.bf16.msra.mxu0 %v548_v48  ;;  %864 = vmatpush1.bf16.msra.mxu1 %v554_v49 }
 0x22e   :  { %1202 = vmatprep.subr.msk.bf16.mxu0 %vm531_vm3, %v518_v8  ;;  %1204 = vmatprep.subr.msk.bf16.mxu1 %vm531_vm3, %v520_v28 }
 0x22f   :  { %840 = vmatprep.mubr.bf16.mxu0 %v1237_v3  ;;  %881 = vmatprep.mubr.bf16.mxu1 %v1237_v3 }
 0x234   :  { %1198 = vmatmul.mubr.msk.bf16.vlgmr.msra.gmra.mxu0 %vm527_vm4, %v1184_v45  ;;  %1200 = vmatmul.mubr.msk.bf16.vlgmr.msra.gmra.mxu1 %vm527_vm4, %v1184_v45 }
 0x235   :  { %910 = vmatpush1.bf16.msra.mxu0 %v539_v29  ;;  %951 = vmatpush1.bf16.msra.mxu1 %v545_v37 }
 0x236   :  { %1206 = vmatprep.subr.msk.bf16.mxu0 %vm531_vm3, %v522_v30  ;;  %927 = vmatprep.mubr.bf16.mxu0 %v1237_v3 }
 0x237   :  { %968 = vmatprep.mubr.bf16.mxu1 %v1237_v3  ;;  %1211 = vmatprep.subr.bf16.mxu1 %v1238_v52 }
 0x23c   :  { %1203 = vmatmul.mubr.msk.bf16.vlgmr.msra.gmra.mxu0 %vm527_vm4, %v1201_v55  ;;  %1205 = vmatmul.mubr.msk.bf16.vlgmr.msra.gmra.mxu1 %vm527_vm4, %v1201_v55 }
 0x23d   :  { %992 = vmatpush1.bf16.msra.mxu0 %v551_v40  ;;  %1212 = vmatpush3.bf16.msra.mxu1 %v724_v56 }
 0x23e   :  { %1009 = vmatprep.mubr.bf16.mxu0 %v1237_v3  ;;  %1213 = vmatprep.mubr.msk.bf16.mxu1 %vm1239_vm5, %v1238_v52 }
 0x244   :  { %1207 = vmatmul.mubr.msk.bf16.vlgmr.msra.gmra.mxu0 %vm527_vm4, %v1201_v55  ;;  %1214 = vmatmul.mubr.msk.bf16.vlgmr.msra.gmra.mxu1 %vm527_vm4, %v1201_v55 }
 0x2dc   :  { %v590_v58 = vpop.f32.mrf.mxu0  ;;  %v631_v50 = vpop.f32.mrf.mxu1 }
 0x2de   :  { %v592_v59 = vpop.f32.mrf.mxu0  ;;  %v633_v51 = vpop.f32.mrf.mxu1 }
 0x2e0   :  { %v594_v53 = vpop.f32.mrf.mxu0  ;;  %v635_v61 = vpop.f32.mrf.mxu1 }
 0x2e2   :  { %v595_v63 = vpop.f32.mrf.mxu0  ;;  %v636_v0 = vpop.f32.mrf.mxu1 }
 0x2e4   :  { %v672_v1 = vpop.f32.mrf.mxu0  ;;  %v713_v17 = vpop.f32.mrf.mxu1 }
 0x2e6   :  { %v674_v2 = vpop.f32.mrf.mxu0  ;;  %v715_v18 = vpop.f32.mrf.mxu1 }
 0x2e8   :  { %v676_v54 = vpop.f32.mrf.mxu0  ;;  %v717_v3 = vpop.f32.mrf.mxu1 }
 0x2ea   :  { %v677_v4 = vpop.f32.mrf.mxu0  ;;  %v718_v5 = vpop.f32.mrf.mxu1 }
 0x2ec   :  { %v760_v6 = vpop.f32.mrf.mxu0  ;;  %v801_v23 = vpop.f32.mrf.mxu1 }
 0x2ed   :  { %v761_v32 = vadd.f32 %v760_v6, %v590_v58  ;;  %v802_v25 = vadd.f32 %v801_v23, %v631_v50 }
 0x2ee   :  { %v762_v7 = vpop.f32.mrf.mxu0  ;;  %v803_v9 = vpop.f32.mrf.mxu1 }
 0x2ef   :  { %v763_v33 = vadd.f32 %v762_v7, %v592_v59  ;;  %v804_v38 = vadd.f32 %v803_v9, %v633_v51 }
 0x2f0   :  { %v764_v10 = vpop.f32.mrf.mxu0  ;;  %v805_v11 = vpop.f32.mrf.mxu1 }
 0x2f2   :  { %v765_v12 = vpop.f32.mrf.mxu0  ;;  %v806_v13 = vpop.f32.mrf.mxu1 }
 0x2f4   :  { %v842_v14 = vpop.f32.mrf.mxu0  ;;  %v883_v15 = vpop.f32.mrf.mxu1 }
 0x2f5   :  { %v843_v42 = vadd.f32 %v842_v14, %v672_v1  ;;  %v884_v52 = vadd.f32 %v883_v15, %v713_v17 }
 0x2f6   :  { %v844_v57 = vpop.f32.mrf.mxu0  ;;  %v885_v16 = vpop.f32.mrf.mxu1 }
 0x2f7   :  { %v845_v55 = vadd.f32 %v844_v57, %v674_v2  ;;  %v886_v54 = vadd.f32 %v885_v16, %v715_v18 }
 0x2f8   :  { %v846_v60 = vpop.f32.mrf.mxu0  ;;  %v887_v19 = vpop.f32.mrf.mxu1 }
 0x2f9   :  { %v1084_v2 = vmul.f32 %v886_v54, %v886_v54  ;;  %v1098_v19 = vld [vmem:[%s1610_s5] sm:$0xff] }
 0x2fa   :  { %v847_v62 = vpop.f32.mrf.mxu0  ;;  %v888_v20 = vpop.f32.mrf.mxu1 }
 0x2fc   :  { %v929_v21 = vpop.f32.mrf.mxu0  ;;  %v970_v22 = vpop.f32.mrf.mxu1 }
 0x2fd   :  { %v1557_v26 = vadd.f32 %v929_v21, %v761_v32  ;;  %v1559_v28 = vadd.f32 %v970_v22, %v802_v25  ;;  %v1102_v32 = vld [vmem:[%s1611_s6] sm:$0xff] }
 0x2fe   :  { %v931_v8 = vpop.f32.mrf.mxu0  ;;  %v972_v27 = vpop.f32.mrf.mxu1 }
 0x2ff   :  { %v1561_v29 = vadd.f32 %v931_v8, %v763_v33  ;;  %v1077_v34 = vmul.f32 %v1557_v26, %v1557_v26  ;;  %v1062_v37 = vadd.f32 %v972_v27, %v804_v38  ;;  %v1079_v39 = vmul.f32 %v1559_v28, %v1559_v28 }
 0x300   :  { %v933_v30 = vpop.f32.mrf.mxu0  ;;  %v974_v31 = vpop.f32.mrf.mxu1 }
 0x301   :  { %v1067_v35 = vadd.f32 %v1561_v29, %v1557_v26  ;;  %v1078_v36 = vmul.f32 %v1561_v29, %v1561_v29  ;;  %v1080_v45 = vmul.f32 %v1062_v37, %v1062_v37 }
 0x302   :  { %v934_v40 = vpop.f32.mrf.mxu0  ;;  %v975_v41 = vpop.f32.mrf.mxu1 }
 0x303   :  { %v1085_v43 = vadd.f32 %v1078_v36, %v1077_v34  ;;  %v1068_v46 = vadd.f32 %v1067_v35, %v1559_v28 }
 0x304   :  { %v1011_v24 = vpop.f32.mrf.mxu0  ;;  %v1052_v44 = vpop.f32.mrf.mxu1 }
 0x305   :  { %v1069_v47 = vadd.f32 %v1068_v46, %v1062_v37  ;;  %v1086_v48 = vadd.f32 %v1085_v43, %v1079_v39  ;;  %v1063_v49 = vadd.f32 %v1011_v24, %v843_v42  ;;  %v1065_v53 = vadd.f32 %v1052_v44, %v884_v52 }
 0x306   :  { %v1013_v56 = vpop.f32.mrf.mxu0  ;;  %v1215_v58 = vpop.f32.mrf.mxu1 }
 0x307   :  { %v1087_v50 = vadd.f32 %v1086_v48, %v1080_v45  ;;  %v1070_v59 = vadd.f32 %v1069_v47, %v1063_v49  ;;  %v1081_v51 = vmul.f32 %v1063_v49, %v1063_v49  ;;  %v1064_v61 = vadd.f32 %v1013_v56, %v845_v55 }
 0x308   :  { %v1015_v63 = vpop.f32.mrf.mxu0  ;;  %v1056_v0 = vpop.f32.mrf.mxu1  ;;  %v1083_v23 = vmul.f32 %v1065_v53, %v1065_v53 }
 0x309   :  { %v1088_v1 = vadd.f32 %v1087_v50, %v1081_v51  ;;  %v1071_v3 = vadd.f32 %v1070_v59, %v1064_v61  ;;  %v1082_v4 = vmul.f32 %v1064_v61, %v1064_v61 }
 0x30a   :  { %v1016_v5 = vpop.f32.mrf.mxu0  ;;  %v1216_v6 = vpop.f32.mrf.mxu1 }
 0x30b   :  { %v1072_v7 = vadd.f32 %v1071_v3, %v1065_v53  ;;  %v1089_v9 = vadd.f32 %v1088_v1, %v1082_v4 }
 0x30d   :  { %v1073_v17 = vadd.f32 %v1072_v7, %v886_v54  ;;  %v1090_v10 = vadd.f32 %v1089_v9, %v1083_v23 }
 0x30f   :  { %1074 = vadd.xlane.f32.xlu1 %v1073_v17  ;;  %v1091_v11 = vadd.f32 %v1090_v10, %v1084_v2 }
 0x311   :  { %1092 = vadd.xlane.f32.xlu0 %v1091_v11 }
 0x398   :  { %v1075_v12 = vpop.xlane.xlu1 %1074 }
 0x399   :  { %v1076_v13 = vmul.f32 0.0009765625, %v1075_v12 }
 0x39a   :  { %v1093_v14 = vpop.xlane.xlu0 %1092 }
 0x39b   :  { %v1095_v15 = vmul.f32 %v1076_v13, %v1076_v13  ;;  %v1094_v57 = vmul.f32 0.0009765625, %v1093_v14 }
 0x39d   :  { %v1096_v60 = vsub.f32 %v1094_v57, %v1095_v15 }
 0x39f   :  { %v1097_v18 = vmax.f32 %v1096_v60, 0.0 }
 0x3a1   :  { %v1099_v16 = vadd.f32 1e-05, %v1097_v18 }
 0x3a3   :  { %1235 = vrsqrt.f32 %v1099_v16 }
 0x3b0   :  { %v1236_v62 = vpop.eup %1235 }
 0x3b1   :  { %v1101_v20 = vmul.f32 %v1236_v62, %v1098_v19 }
 0x3b3   :  { %1107 = vperm.xlu1 %1221, %v1101_v20   ;;  %v1103_v21 = vmul.f32 %v1101_v20, %v1076_v13 }
 0x3b5   :  { %v1104_v22 = vsub.f32 %v1102_v32, %v1103_v21 }
 0x3b7   :  { %1120 = vperm.xlu0 %1220, %v1104_v22  }
 0x42e   :  { %v1108_v25 = vpop.permute.xlu1 %1107 }
 0x42f   :  { %v1110_v33 = vmul.f32 %v1108_v25, %v1557_v26  ;;  %v1111_v8 = vmul.f32 %v1108_v25, %v1561_v29  ;;  %v1112_v27 = vmul.f32 %v1108_v25, %v1559_v28  ;;  %v1113_v38 = vmul.f32 %v1108_v25, %v1062_v37 }
 0x430   :  { %v1114_v30 = vmul.f32 %v1108_v25, %v1063_v49  ;;  %v1115_v31 = vmul.f32 %v1108_v25, %v1064_v61  ;;  %v1116_v34 = vmul.f32 %v1108_v25, %v1065_v53  ;;  %v1117_v35 = vmul.f32 %v1108_v25, %v886_v54 }
 0x432   :  { %v1121_v36 = vpop.permute.xlu0 %1120 }
 0x433   :  { %v1123_v40 = vadd.f32 %v1121_v36, %v1110_v33  ;;  %v1124_v41 = vadd.f32 %v1121_v36, %v1111_v8  ;;  %v1125_v42 = vadd.f32 %v1121_v36, %v1112_v27  ;;  %v1126_v39 = vadd.f32 %v1121_v36, %v1113_v38 }
 0x434   :  { %v1127_v43 = vadd.f32 %v1121_v36, %v1114_v30  ;;  %v1128_v46 = vadd.f32 %v1121_v36, %v1115_v31  ;;  %v1129_v24 = vadd.f32 %v1121_v36, %v1116_v34  ;;  %v1130_v44 = vadd.f32 %v1121_v36, %v1117_v35 }
 0x435   :  { %v1131_v47 = vmax.f32 %v1123_v40, 0.0  ;;  %v1132_v26 = vmax.f32 %v1124_v41, 0.0  ;;  %v1133_v45 = vmax.f32 %v1125_v42, 0.0  ;;  %v1134_v29 = vmax.f32 %v1126_v39, 0.0 }
 0x436   :  { %v1135_v48 = vmax.f32 %v1127_v43, 0.0  ;;  %v1136_v28 = vmax.f32 %v1128_v46, 0.0  ;;  %v1137_v37 = vmax.f32 %v1129_v24, 0.0  ;;  %v1138_v49 = vmax.f32 %v1130_v44, 0.0 }
 0x437   :  { %1139 = vst [vmem:[%s1612_s7] sm:$0xff] %v1131_v47  ;;  %1140 = vst [vmem:[%s1612_s7 + $0x8] sm:$0xff] %v1132_v26 }
 0x438   :  { %1141 = vst [vmem:[%s1612_s7 + $0x10] sm:$0xff] %v1133_v45  ;;  %1142 = vst [vmem:[%s1612_s7 + $0x18] sm:$0xff] %v1134_v29 }
 0x439   :  { %1143 = vst [vmem:[%s1612_s7 + $0x20] sm:$0xff] %v1135_v48  ;;  %1144 = vst [vmem:[%s1612_s7 + $0x28] sm:$0xff] %v1136_v28 }
 0x43a   :  { %1145 = vst [vmem:[%s1612_s7 + $0x30] sm:$0xff] %v1137_v37  ;;  %1146 = vst [vmem:[%s1612_s7 + $0x38] sm:$0xff] %v1138_v49 }

</bundles_post_ra>
